<compile_context>
chip_gen: v7x
topology: tpu7x:2x2x1
jax: 0.10.0
libtpu: 0.0.40
codegen_flags: <defaults>
</compile_context>

<pallas_src>
import functools

import jax
import jax.numpy as jnp
import numpy as np
from jax.experimental import pallas as pl
from jax.experimental.pallas import tpu as pltpu

EPS = 1e-5           # InstanceNorm3d default eps
NEG_SLOPE = 0.01     # LeakyReLU default negative_slope


def _round_up(x, m):
    return ((x + m - 1) // m) * m


def _interconv_kernel(p_ref, w_ref, o_ref, sum_ref, sq_ref, *, tp, inv_p):
    # p_ref:   (1, Kp, TP)   bf16  -- im2col patch tile for this sample
    # w_ref:   (Cout, Kp)    bf16  -- flattened conv weight (VMEM resident)
    # o_ref:   (1, Cout, Pp) f32   -- per-sample resident output / accumulator
    # sum_ref: (Cout, 1)     f32   -- running per-channel sum
    # sq_ref:  (Cout, 1)     f32   -- running per-channel sum of squares
    pt = pl.program_id(1)

    @pl.when(pt == 0)
    def _():
        sum_ref[...] = jnp.zeros_like(sum_ref)
        sq_ref[...] = jnp.zeros_like(sq_ref)

    # Conv3d tile as a lane-dense MXU matmul with f32 accumulation.
    tile = jnp.dot(w_ref[...], p_ref[0],
                   preferred_element_type=jnp.float32)            # (Cout, TP)

    # Instance-norm statistics while the tile is hot.  Zero-padded P columns
    # (weight @ 0 = 0) contribute nothing to either sum.
    sum_ref[...] += jnp.sum(tile, axis=1, keepdims=True)
    sq_ref[...] += jnp.sum(tile * tile, axis=1, keepdims=True)

    off = pl.multiple_of(pt * tp, 128)
    o_ref[0, :, pl.ds(off, tp)] = tile                            # dense vst

    # Finalize once the whole P range for this sample is resident in VMEM.
    @pl.when(pt == pl.num_programs(1) - 1)
    def _():
        mean = sum_ref[...] * inv_p                               # (Cout, 1)
        var = sq_ref[...] * inv_p - mean * mean                   # biased var
        inv_std = jax.lax.rsqrt(var + EPS)
        y = (o_ref[0] - mean) * inv_std                           # (Cout, Pp)
        o_ref[0] = jnp.where(y >= 0, y, NEG_SLOPE * y).astype(o_ref.dtype)


def _im2col_kp(x, kernel, stride, padding):
    """x: (N, Cin, D, H, W) -> patches (N, K, P), K ordered (cin, dz, dy, dx)."""
    N, Cin, D, H, W = x.shape
    k, s, p = kernel, stride, padding
    Do = (D + 2 * p - k) // s + 1
    Ho = (H + 2 * p - k) // s + 1
    Wo = (W + 2 * p - k) // s + 1
    xp = jnp.pad(x, ((0, 0), (0, 0), (p, p), (p, p), (p, p)))
    taps = []
    for dz in range(k):
        for dy in range(k):
            for dx in range(k):
                taps.append(xp[:, :,
                               dz:dz + s * Do:s,
                               dy:dy + s * Ho:s,
                               dx:dx + s * Wo:s])                 # (N,Cin,Do,Ho,Wo)
    pat = jnp.stack(taps, axis=2)                                 # (N,Cin,k^3,Do,Ho,Wo)
    pat = pat.reshape(N, Cin * k ** 3, Do * Ho * Wo)              # (N, K, P)
    return pat, (Do, Ho, Wo)


@functools.partial(jax.jit, static_argnames=("kernel", "stride", "padding"))
def interconv_forward(x, weight, bias, *, kernel, stride, padding):
    """x: (N,Cin,D,H,W); weight: (Cout,Cin,k,k,k); bias: (Cout,) (ignored --
    exactly cancelled by the affine-free InstanceNorm3d).
    Returns (N, Cout, Do, Ho, Wo), matching the PyTorch module's forward."""
    del bias  # cancelled by InstanceNorm3d(affine=False)

    N, Cin = x.shape[0], x.shape[1]
    Cout = weight.shape[0]
    K = Cin * kernel ** 3

    patches, (Do, Ho, Wo) = _im2col_kp(x, kernel, stride, padding)
    P = Do * Ho * Wo

    # Pad the contraction dim to a 128 multiple; tile P in 128-multiple chunks.
    Kp = _round_up(K, 128)
    TP = min(2048, _round_up(P, 128))
    PT = -(-P // TP)
    Pp = PT * TP

    patches = jnp.pad(patches, ((0, 0), (0, Kp - K), (0, Pp - P)))
    patches = patches.astype(jnp.bfloat16)                        # (N, Kp, Pp)
    w2d = jnp.pad(weight.reshape(Cout, K), ((0, 0), (0, Kp - K)))
    w2d = w2d.astype(jnp.bfloat16)                                # (Cout, Kp)

    kern = functools.partial(_interconv_kernel, tp=TP, inv_p=1.0 / P)

    out = pl.pallas_call(
        kern,
        out_shape=jax.ShapeDtypeStruct((N, Cout, Pp), jnp.float32),
        grid=(N, PT),
        in_specs=[
            pl.BlockSpec((1, Kp, TP), lambda n, t: (n, 0, t)),
            pl.BlockSpec((Cout, Kp), lambda n, t: (0, 0)),
        ],
        # Constant block index along the P-tile axis -> the output block stays
        # resident in VMEM per sample and doubles as the conv accumulator.
        out_specs=pl.BlockSpec((1, Cout, Pp), lambda n, t: (n, 0, 0)),
        scratch_shapes=[
            pltpu.VMEM((Cout, 1), jnp.float32),   # running sum
            pltpu.VMEM((Cout, 1), jnp.float32),   # running sum of squares
        ],
        compiler_params=pltpu.CompilerParams(
            dimension_semantics=("parallel", "arbitrary"),
            vmem_limit_bytes=64 * 1024 * 1024,
        ),
        cost_estimate=pl.CostEstimate(
            flops=2 * N * Cout * Kp * Pp,
            transcendentals=N * Cout,
            bytes_accessed=(N * Kp * Pp * 2 + Cout * Kp * 2
                            + N * Cout * Pp * 4),
        ),
    )(patches, w2d)

    out = out[:, :, :P].reshape(N, Cout, Do, Ho, Wo)              # free reshape
    return out


def _reference(x, weight, bias, *, kernel, stride, padding):
    """Pure-JAX reference: lax conv (with bias) + instance norm + leaky relu."""
    y = jax.lax.conv_general_dilated(
        x, weight,
        window_strides=(stride,) * 3,
        padding=[(padding, padding)] * 3,
        dimension_numbers=("NCDHW", "OIDHW", "NCDHW"),
    ) + bias.reshape(1, -1, 1, 1, 1)
    mean = y.mean(axis=(2, 3, 4), keepdims=True)
    var = ((y - mean) ** 2).mean(axis=(2, 3, 4), keepdims=True)
    yn = (y - mean) / jnp.sqrt(var + EPS)
    return jnp.where(yn >= 0, yn, NEG_SLOPE * yn)


if __name__ == "__main__":
    # Module hyperparameters (n_block only names the layers; no compute effect).
    in_channels, out_channels = 4, 8
    kernel, stride, padding = 3, 1, 1
    N, D, H, W = 2, 8, 8, 8

    key = jax.random.PRNGKey(0)
    kx, kw, kb = jax.random.split(key, 3)
    x = jax.random.normal(kx, (N, in_channels, D, H, W), dtype=jnp.float32)
    fan_in = in_channels * kernel ** 3
    bound = 1.0 / np.sqrt(fan_in)
    weight = jax.random.uniform(
        kw, (out_channels, in_channels, kernel, kernel, kernel),
        minval=-bound, maxval=bound, dtype=jnp.float32)
    bias = jax.random.uniform(kb, (out_channels,),
                              minval=-bound, maxval=bound, dtype=jnp.float32)

    out = jax.block_until_ready(
        interconv_forward(x, weight, bias,
                          kernel=kernel, stride=stride, padding=padding))

    ref = jax.block_until_ready(
        _reference(x, weight, bias, kernel=kernel, stride=stride,
                   padding=padding))
    # bf16 matmul inputs -> loosened tolerance (f32 accumulation + f32 norm).
    np.testing.assert_allclose(np.asarray(out), np.asarray(ref),
                               rtol=3e-2, atol=3e-2)
    print("KERNEL_OK")
</pallas_src>

<mosaic_0001>
module attributes {stable_mosaic.version = 11 : i64} {
  func.func @_interconv_kernel(%arg0: i32, %arg1: i32, %arg2: memref<1x128x512xbf16, #tpu.memory_space<vmem>>, %arg3: memref<8x128xbf16, #tpu.memory_space<vmem>>, %arg4: memref<1x8x512xf32, #tpu.memory_space<vmem>>, %arg5: memref<8x1xf32, #tpu.memory_space<vmem>>, %arg6: memref<8x1xf32, #tpu.memory_space<vmem>>) attributes {dimension_semantics = [#tpu.dimension_semantics<parallel>, #tpu.dimension_semantics<arbitrary>], iteration_bounds = array<i64: 2, 1>, scalar_prefetch = 0 : i64, scratch_operands = 2 : i64, tpu.core_type = #tpu.core_type<tc>, window_params = [{transform_indices = @transform_0, window_bounds = array<i64: 1, 128, 512>}, {pipeline_mode = #tpu.pipeline_mode<synchronous>, transform_indices = @transform_1, window_bounds = array<i64: 8, 128>}, {transform_indices = @transform_2, window_bounds = array<i64: 1, 8, 512>}]} {
    %c0_i32 = arith.constant 0 : i32
    %0 = arith.cmpi eq, %arg1, %c0_i32 : i32
    %1 = arith.extui %0 : i1 to i32
    %c0_i32_0 = arith.constant 0 : i32
    %2 = arith.cmpi ne, %1, %c0_i32_0 : i32
    scf.if %2 {
      %cst_19 = arith.constant 0.000000e+00 : f32
      %27 = vector.broadcast %cst_19 : f32 to vector<8x1xf32>
      %c0_20 = arith.constant 0 : index
      %c0_21 = arith.constant 0 : index
      %28 = vector.load %arg5[%c0_20, %c0_21] : memref<8x1xf32, #tpu.memory_space<vmem>>, vector<8x1xf32>
      tpu.vector_store %arg5[%c0_20, %c0_21], %27 {strides = array<i32>} : memref<8x1xf32, #tpu.memory_space<vmem>>, vector<8x1xf32>,
      %cst_22 = arith.constant 0.000000e+00 : f32
      %29 = vector.broadcast %cst_22 : f32 to vector<8x1xf32>
      %c0_23 = arith.constant 0 : index
      %c0_24 = arith.constant 0 : index
      %30 = vector.load %arg6[%c0_23, %c0_24] : memref<8x1xf32, #tpu.memory_space<vmem>>, vector<8x1xf32>
      tpu.vector_store %arg6[%c0_23, %c0_24], %29 {strides = array<i32>} : memref<8x1xf32, #tpu.memory_space<vmem>>, vector<8x1xf32>,
    } else {
    }
    %c0 = arith.constant 0 : index
    %c0_1 = arith.constant 0 : index
    %3 = vector.load %arg3[%c0, %c0_1] : memref<8x128xbf16, #tpu.memory_space<vmem>>, vector<8x128xbf16>
    %c0_2 = arith.constant 0 : index
    %c0_3 = arith.constant 0 : index
    %c0_4 = arith.constant 0 : index
    %4 = vector.load %arg2[%c0_2, %c0_3, %c0_4] : memref<1x128x512xbf16, #tpu.memory_space<vmem>>, vector<1x128x512xbf16>
    %5 = vector.shape_cast %4 : vector<1x128x512xbf16> to vector<128x512xbf16>
    %cst = arith.constant dense<0.000000e+00> : vector<8x512xf32>
    %6 = tpu.matmul %3, %5, %cst {dimension_numbers = #tpu.dot_dimension_numbers<[1], [0], [0], [1], [0, 0, 1, 1], [], []>} : vector<8x128xbf16>, vector<128x512xbf16>, vector<8x512xf32> -> vector<8x512xf32>
    %c0_5 = arith.constant 0 : index
    %c0_6 = arith.constant 0 : index
    %7 = vector.load %arg5[%c0_5, %c0_6] : memref<8x1xf32, #tpu.memory_space<vmem>>, vector<8x1xf32>
    %cst_7 = arith.constant dense<0.000000e+00> : vector<8xf32>
    %8 = vector.multi_reduction <add>, %6, %cst_7 [1] : vector<8x512xf32> to vector<8xf32>
    %9 = vector.shape_cast %8 : vector<8xf32> to vector<8x1xf32>
    %10 = arith.addf %7, %9 : vector<8x1xf32>
    %c0_8 = arith.constant 0 : index
    %c0_9 = arith.constant 0 : index
    %11 = vector.load %arg5[%c0_8, %c0_9] : memref<8x1xf32, #tpu.memory_space<vmem>>, vector<8x1xf32>
    tpu.vector_store %arg5[%c0_8, %c0_9], %10 {strides = array<i32>} : memref<8x1xf32, #tpu.memory_space<vmem>>, vector<8x1xf32>,
    %c0_10 = arith.constant 0 : index
    %c0_11 = arith.constant 0 : index
    %12 = vector.load %arg6[%c0_10, %c0_11] : memref<8x1xf32, #tpu.memory_space<vmem>>, vector<8x1xf32>
    %13 = arith.mulf %6, %6 : vector<8x512xf32>
    %cst_12 = arith.constant dense<0.000000e+00> : vector<8xf32>
    %14 = vector.multi_reduction <add>, %13, %cst_12 [1] : vector<8x512xf32> to vector<8xf32>
    %15 = vector.shape_cast %14 : vector<8xf32> to vector<8x1xf32>
    %16 = arith.addf %12, %15 : vector<8x1xf32>
    %c0_13 = arith.constant 0 : index
    %c0_14 = arith.constant 0 : index
    %17 = vector.load %arg6[%c0_13, %c0_14] : memref<8x1xf32, #tpu.memory_space<vmem>>, vector<8x1xf32>
    tpu.vector_store %arg6[%c0_13, %c0_14], %16 {strides = array<i32>} : memref<8x1xf32, #tpu.memory_space<vmem>>, vector<8x1xf32>,
    %c512_i32 = arith.constant 512 : i32
    %18 = arith.muli %arg1, %c512_i32 : i32
    %19 = tpu.assume_multiple %18, 128 : i32
    %c0_15 = arith.constant 0 : index
    %c0_16 = arith.constant 0 : index
    %20 = arith.index_cast %19 : i32 to index
    %21 = vector.load %arg4[%c0_15, %c0_16, %20] : memref<1x8x512xf32, #tpu.memory_space<vmem>>, vector<1x8x512xf32>
    %22 = vector.shape_cast %21 : vector<1x8x512xf32> to vector<8x512xf32>
    %23 = vector.shape_cast %6 : vector<8x512xf32> to vector<1x8x512xf32>
    tpu.vector_store %arg4[%c0_15, %c0_16, %20], %23 {strides = array<i32>} : memref<1x8x512xf32, #tpu.memory_space<vmem>>, vector<1x8x512xf32>,
    %c0_i32_17 = arith.constant 0 : i32
    %24 = arith.cmpi eq, %arg1, %c0_i32_17 : i32
    %25 = arith.extui %24 : i1 to i32
    %c0_i32_18 = arith.constant 0 : i32
    %26 = arith.cmpi ne, %25, %c0_i32_18 : i32
    scf.if %26 {
      %c0_19 = arith.constant 0 : index
      %c0_20 = arith.constant 0 : index
      %27 = vector.load %arg5[%c0_19, %c0_20] : memref<8x1xf32, #tpu.memory_space<vmem>>, vector<8x1xf32>
      %cst_21 = arith.constant 0.001953125 : f32
      %28 = vector.broadcast %cst_21 : f32 to vector<8x1xf32>
      %29 = arith.mulf %27, %28 : vector<8x1xf32>
      %c0_22 = arith.constant 0 : index
      %c0_23 = arith.constant 0 : index
      %30 = vector.load %arg6[%c0_22, %c0_23] : memref<8x1xf32, #tpu.memory_space<vmem>>, vector<8x1xf32>
      %cst_24 = arith.constant 0.001953125 : f32
      %31 = vector.broadcast %cst_24 : f32 to vector<8x1xf32>
      %32 = arith.mulf %30, %31 : vector<8x1xf32>
      %33 = arith.mulf %29, %29 : vector<8x1xf32>
      %34 = arith.subf %32, %33 : vector<8x1xf32>
      %cst_25 = arith.constant 9.99999974E-6 : f32
      %35 = vector.broadcast %cst_25 : f32 to vector<8x1xf32>
      %36 = arith.addf %34, %35 : vector<8x1xf32>
      %37 = math.rsqrt %36 : vector<8x1xf32>
      %c0_26 = arith.constant 0 : index
      %c0_27 = arith.constant 0 : index
      %c0_28 = arith.constant 0 : index
      %38 = vector.load %arg4[%c0_26, %c0_27, %c0_28] : memref<1x8x512xf32, #tpu.memory_space<vmem>>, vector<1x8x512xf32>
      %39 = vector.shape_cast %38 : vector<1x8x512xf32> to vector<8x512xf32>
      %40 = vector.broadcast %29 : vector<8x1xf32> to vector<8x512xf32>
      %41 = arith.subf %39, %40 : vector<8x512xf32>
      %42 = vector.broadcast %37 : vector<8x1xf32> to vector<8x512xf32>
      %43 = arith.mulf %41, %42 : vector<8x512xf32>
      %cst_29 = arith.constant 0.000000e+00 : f32
      %44 = vector.broadcast %cst_29 : f32 to vector<8x512xf32>
      %45 = arith.cmpf oge, %43, %44 : vector<8x512xf32>
      %cst_30 = arith.constant 0.00999999977 : f32
      %46 = vector.broadcast %cst_30 : f32 to vector<8x512xf32>
      %47 = arith.mulf %46, %43 : vector<8x512xf32>
      %48 = arith.select %45, %43, %47 : vector<8x512xi1>, vector<8x512xf32>
      %c0_31 = arith.constant 0 : index
      %c0_32 = arith.constant 0 : index
      %c0_33 = arith.constant 0 : index
      %49 = vector.load %arg4[%c0_31, %c0_32, %c0_33] : memref<1x8x512xf32, #tpu.memory_space<vmem>>, vector<1x8x512xf32>
      %50 = vector.shape_cast %49 : vector<1x8x512xf32> to vector<8x512xf32>
      %51 = vector.shape_cast %48 : vector<8x512xf32> to vector<1x8x512xf32>
      tpu.vector_store %arg4[%c0_31, %c0_32, %c0_33], %51 {strides = array<i32>} : memref<1x8x512xf32, #tpu.memory_space<vmem>>, vector<1x8x512xf32>,
    } else {
    }
    return
  }
  func.func @transform_0(%arg0: i32, %arg1: i32) -> (i32, i32, i32) {
    %c0_i32 = arith.constant 0 : i32
    %c0_i32_0 = arith.constant 0 : i32
    return %arg0, %c0_i32, %arg1 : i32, i32, i32
  }
  func.func @transform_1(%arg0: i32, %arg1: i32) -> (i32, i32) {
    %c0_i32 = arith.constant 0 : i32
    %c0_i32_0 = arith.constant 0 : i32
    %c0_i32_1 = arith.constant 0 : i32
    return %c0_i32, %c0_i32_0 : i32, i32
  }
  func.func @transform_2(%arg0: i32, %arg1: i32) -> (i32, i32, i32) {
    %c0_i32 = arith.constant 0 : i32
    %c0_i32_0 = arith.constant 0 : i32
    %c0_i32_1 = arith.constant 0 : i32
    return %arg0, %c0_i32, %c0_i32_0 : i32, i32, i32
  }
}

</mosaic_0001>

<bundles_post_ra>
// kernel: interconv_forward.1
= control target key start
LH: loop header
LB: loop body
LE: loop exit
PB: predicated region body
PF: predicated region fallthrough
CT: control target
= control target key end

     0   :  { %7 = vsyncpa [#allocation5], 0  ;;  %s1268_s0 = inlined_call_operand.hbm [shape: bf16[2,128,512], index: 0, kind: input, shape index: {}]   ;;  %s1269_s1 = inlined_call_operand.hbm [shape: bf16[8,128], index: 1, kind: input, shape index: {}]   ;;  %s1270_s2 = inlined_call_operand.hbm [shape: f32[2,8,512], index: 2, kind: output, shape index: {}]  }
   0x1   :  { %9 = vsyncpa [#allocation5 + $0x1], 0 }
   0x2   :  { %10 = vsyncpa [#allocation8], 0 }
   0x3   :  { %11 = vsyncpa [#allocation6], 0 }
   0x4   :  { %13 = vsyncpa [#allocation6 + $0x1], 0  ;;  %s1010_s9 = smov 0   ;;  %s1012_s10 = smov 0  }
   0x5   :  { %s1014_s11 = smov 0   ;;  %s1016_s12 = smov 0  }
   0x6   :  { %s1018_s13 = smov 0   ;;  %s1020_s14 = smov 0  }
   0x7 LB: > { %s662_s15 = sadd.s32 4294967295, %s986_s14   ;;  %s663_s16 = sadd.s32 4294967294, %s986_s14   ;;  %s986_s14 = sphi %s1020_s14, %s19_s14   ;;  %s982_s13 = sphi %s1018_s13, %s1298_s13   ;;  %s978_s12 = sphi %s1016_s12, %s1297_s12   ;;  %s974_s11 = sphi %s1014_s11, %s1296_s11   ;;  %s970_s10 = sphi %s1012_s10, %s1295_s10   ;;  %s966_s9 = sphi %s1010_s9, %s1294_s9  }
   0x8   : > { %s40_s17 = sadd.s32 1, %s974_s11  ;;  %p47_p0 = scmp.ne.s32.totalorder %s974_s11, %s970_s10 }
   0x9   : > { %p48_p1 = scmp.eq.s32.totalorder %s986_s14, 0  ;;  %p53_p2 = scmp.ne.s32.totalorder %s970_s10, %s966_s9 }
   0xa   : > { %p1048_p3 = scmp.eq.s32.totalorder %s662_s15, 0  ;;  %p98_p4 = scmp.eq.s32.totalorder %s662_s15, 1 }
   0xb   : > { %p1052_p5 = por %p48_p1, %p47_p0  ;;  %p104_p6 = scmp.eq.s32.totalorder %s663_s16, 1 }
   0xc   : > { %s1277_s18 = scalar_select %p1048_p3, 1, 0 }
   0xd   : > { %p1058_p7 = por %p1048_p3, %p53_p2  ;;  %p1062_p8 = por %p98_p4, %p47_p0 }
   0xe   : > { %p1066_p9 = por %p104_p6, %p53_p2  ;;  %p664_p10 = scmp.ge.s32.totalorder %s986_s14, 1 }
   0xf   : > { %s1279_s20 = scalar_select %p1058_p7, 1, 0 }
  0x10   : > { %s1280_s21 = scalar_select %p1062_p8, 1, 0 }
  0x11   : > { %s1281_s22 = scalar_select %p1066_p9, 1, 0 }
  0x12   : > { %p111_p11 = scmp.lt.s32.totalorder %s986_s14, 3  ;;  %s988_s24 = smov [#allocation7]  }
  0x13   : > { %s124_s25 = sshll.u32 %s988_s24, 4  ;;  %p734_p1 = scmp.lt.s32.totalorder %s986_s14, 2  ;;  %s125_s25 = int_to_ptr.vmem [resolvable:$true] %s124_s25 }
  0x14   : > { %p1073_p13 = pnand %p664_p10, %p111_p11  ;;  %s31_s28 = sadd.s32 1, %s982_s13 }
  0x15   : > { %p1082_p4 = pnand %p734_p1, %p1052_p5  ;;  %p1093_p6 = scmp.ge.s32.totalorder %s31_s28, 2 }
  0x16   : > { %s1282_s23 = scalar_select %p1073_p13, 1, 0 }
  0x17   : > { %p721_p0 = pneg %p1073_p13  ;;  %s135_s30 = sand.u32 1, %s974_s11  }
  0x18   : > { %s1283_s26 = scalar_select %p1082_p4, 1, 0 }
  0x19   : > { %p1088_p2 = pnand %p721_p0, %p1048_p3  ;;  %s842_s5 = scalar_lea.hbm %s1269_s1, 64 }
  0x1a   : > { %s1285_s29 = scalar_select %p1093_p6, 1, 0 }
  0x1b   : > { %p843_p5 = scmp.ne.s32.totalorder %s1269_s1, %s842_s5  ;;  %p844_p10 = pneg %p1088_p2 }
  0x1c   : > { %p849_p0 = scmp.lt.u32.totalorder %s842_s5, %s1269_s1 }
  0x1d   : > { %p845_p11 = pnand %p844_p10, %p843_p5 }
  0x1f   : > { %p846_p1 = pneg %p845_p11 }
  0x21   : > { %p851_p12 = pnand %p849_p0, %p846_p1 }
  0x23   : > { %854 = shalt.err (!%p851_p12)
}
  0x24   : > { %s855_s16 = scalar_lea.vmem %s125_s25, 64  ;;  %p863_p7 = scmp.lt.s32.totalorder %s125_s25, %s125_s25 }
  0x25   : > { %p856_p9 = scmp.ne.s32.totalorder %s125_s25, %s855_s16  ;;  %p864_p13 = scmp.lt.s32.totalorder %s855_s16, %s855_s16 }
  0x27   : > { %p858_p8 = pnand %p856_p9, %p844_p10  ;;  %p865_p4 = por %p864_p13, %p863_p7 }
  0x29   : > { %p859_p3 = pneg %p858_p8 }
  0x2b   : > { %p866_p6 = pnand %p865_p4, %p859_p3 }
  0x2d   : > { %869 = shalt.err (!%p866_p6)
}
  0x2e   : > { %724 = dma.hbm_to_vmem [thread:$0]  (!%p1088_p2), %s1269_s1, 64, %s125_s25, [#allocation8]  }
  0x2f   : > { %p1286_p9 = scmp.ne.s32.totalorder %s1285_s29, 0  ;;  %s667_s3 = sshll.u32 %s135_s30, 8 }
  0x30   : > { %s711_s5 = sshll.u32 %s982_s13, 12  ;;  %s139_s8 = scalar_lea.vmem [#allocation4], %s667_s3 }
  0x31   : > { %s1300_s28 = smov (%p1286_p9, %s31_s28), 0  ;;  %s1124_s7 = scalar_lea.hbm %s1268_s0, %s711_s5 }
  0x32   : > { %s35_s4 = ssub.s32 %s982_s13, %s1300_s28  ;;  %s148_s15 = sshll.u32 %s139_s8, 4  ;;  %s1131_s15 = int_to_ptr.vmem [resolvable:$true] %s148_s15 }
  0x33   : > { %p38_p3 = scmp.eq.s32.totalorder %s35_s4, 0  ;;  %s1133_s29 = scalar_lea.sflag [#allocation5], %s135_s30 }
  0x34   : > { %s870_s16 = scalar_lea.hbm %s1124_s7, 4096  ;;  %p1287_p8 = scmp.ne.s32.totalorder %s1283_s26, 0 }
  0x35   : > { %s1129_s25 = scalar_select %p38_p3, %s974_s11, %s40_s17  }
  0x36   : > { %p871_p7 = scmp.ne.s32.totalorder %s1124_s7, %s870_s16  ;;  %p872_p12 = pneg %p1287_p8 }
  0x37   : > { %s875_s3 = scalar_lea.hbm %s1268_s0, 8192  ;;  %p876_p2 = scmp.lt.u32.totalorder %s1124_s7, %s1268_s0 }
  0x38   : > { %p873_p13 = pnand %p872_p12, %p871_p7  ;;  %p877_p6 = scmp.lt.u32.totalorder %s875_s3, %s870_s16 }
  0x39   : > { %p879_p10 = scmp.lt.u32.totalorder %s870_s16, %s1124_s7 }
  0x3a   : > { %p874_p4 = pneg %p873_p13  ;;  %p878_p5 = por %p877_p6, %p876_p2 }
  0x3c   : > { %p880_p11 = por %p879_p10, %p878_p5 }
  0x3e   : > { %p881_p1 = pnand %p880_p11, %p874_p4 }
  0x40   : > { %884 = shalt.err (!%p881_p1)
}
  0x41   : > { %s885_s17 = scalar_lea.vmem %s1131_s15, 4096  ;;  %s989_s30 = smov [#allocation4]  }
  0x42   : > { %p886_p0 = scmp.ne.s32.totalorder %s1131_s15, %s885_s17  ;;  %s890_s27 = sshll.u32 %s989_s30, 4  ;;  %s891_s27 = int_to_ptr.vmem [resolvable:$false] %s890_s27 }
  0x43   : > { %s892_s6 = scalar_lea.vmem %s891_s27, 8192  ;;  %p893_p7 = scmp.lt.s32.totalorder %s1131_s15, %s891_s27 }
  0x44   : > { %p888_p9 = pnand %p886_p0, %p872_p12  ;;  %p894_p13 = scmp.lt.s32.totalorder %s892_s6, %s885_s17 }
  0x46   : > { %p889_p3 = pneg %p888_p9  ;;  %p895_p2 = por %p894_p13, %p893_p7 }
  0x48   : > { %p896_p6 = pnand %p895_p2, %p889_p3 }
  0x4a   : > { %899 = shalt.err (!%p896_p6)
}
  0x4b   : > { %s990_s8 = smov 256   ;;  %s991_s16 = smov 16  }
  0x4c   : > { %728 = dma.hbm_to_vmem [thread:$0]  (!%p1287_p8), %s1124_s7, 4096, %s1131_s15, %s1133_s29, %s990_s8, %s990_s8, %s991_s16  }
  0x4d   : > { %p1288_p12 = scmp.ne.s32.totalorder %s1282_s23, 0 }
  0x4e   : > { %s1164_s19 = sand.u32 (!%p1288_p12), 1, %s970_s10   ;;  %p1289_p4 = scmp.ne.s32.totalorder (!%p1288_p12), %s1279_s20, 0 }
  0x4f   : > { %160 = sbr.rel (%p1288_p12) target bundleno = 666 (0x29a), region = 28  ;;  %s671_s24 = sshll.u32 (!%p1288_p12), %s1164_s19, 8 }
  0x50   : > { %s163_s3 = scalar_lea.sflag (!%p1288_p12), [#allocation5], %s1164_s19  ;;  %s1168_s4 = scalar_lea.vmem (!%p1288_p12), [#allocation4], %s671_s24 }
  0x56   : > { %953 = dma.done.wait (%p1289_p4), %s163_s3, 4096  }
  0x57   : > { %955 = vsyncadd (%p1289_p4), %s163_s3, 4294963200  ;;  %p1290_p8 = scmp.ne.s32.totalorder %s1277_s18, 0 }
  0x59   : > { %957 = dma.done.wait (%p1290_p8), [#allocation8], 64  }
  0x5a   : > { %959 = vsyncadd (%p1290_p8), [#allocation8], 4294967232  ;;  %v992_v0 = vmov 0   ;;  %v792_v1 = vld [vmem:[%s1168_s4 + $0x4] ss:$16 sps:$4 sm:$0xff]   ;;  %vm197_vm0 = vcmask 7168  }
  0x5b   : > { %425 = vmatprep.mubr.bf16.mxu0 %v992_v0  ;;  %466 = vmatprep.mubr.bf16.mxu1 %v992_v0  ;;  %v794_v2 = vld [vmem:[%s1168_s4 + $0xc] ss:$16 sps:$4 sm:$0xff]   ;;  %v796_v3 = vld [vmem:[%s1168_s4] ss:$16 sps:$4 sm:$0xff]   ;;  %v797_v4 = vld [vmem:[%s1168_s4 + $0x8] ss:$16 sps:$4 sm:$0xff]  }
  0x5c   : > { %790 = vset.pattern.permute.xlu1 %v992_v0  ;;  %791 = vset.pattern.permute.xlu0 %v992_v0  ;;  %v798_v5 = vld [vmem:[%s1168_s4 + $0x24] ss:$16 sps:$4 sm:$0xff]   ;;  %v800_v6 = vld [vmem:[%s1168_s4 + $0x2c] ss:$16 sps:$4 sm:$0xff]   ;;  %v802_v7 = vld [vmem:[%s1168_s4 + $0x20] ss:$16 sps:$4 sm:$0xff]  }
  0x5d   : > { %393 = vmatprep.subr.bf16.mxu0 %v792_v1  ;;  %434 = vmatprep.subr.bf16.mxu1 %v794_v2  ;;  %v803_v8 = vld [vmem:[%s1168_s4 + $0x28] ss:$16 sps:$4 sm:$0xff]   ;;  %v804_v9 = vld [vmem:[%s1168_s4 + $0x44] ss:$16 sps:$4 sm:$0xff]   ;;  %v806_v10 = vld [vmem:[%s1168_s4 + $0x4c] ss:$16 sps:$4 sm:$0xff]  }
  0x5e   : > { %394 = vmatpush1.bf16.msra.mxu0 %v796_v3  ;;  %435 = vmatpush1.bf16.msra.mxu1 %v797_v4  ;;  %v808_v11 = vld [vmem:[%s1168_s4 + $0x40] ss:$16 sps:$4 sm:$0xff]   ;;  %v809_v12 = vld [vmem:[%s1168_s4 + $0x48] ss:$16 sps:$4 sm:$0xff]   ;;  %v810_v13 = vld [vmem:[%s1168_s4 + $0x64] ss:$16 sps:$4 sm:$0xff]  }
  0x5f   : > { %395 = vmatprep.subr.bf16.mxu0 %v798_v5  ;;  %436 = vmatprep.subr.bf16.mxu1 %v800_v6  ;;  %v812_v14 = vld [vmem:[%s1168_s4 + $0x6c] ss:$16 sps:$4 sm:$0xff]   ;;  %v814_v15 = vld [vmem:[%s1168_s4 + $0x60] ss:$16 sps:$4 sm:$0xff]   ;;  %v815_v16 = vld [vmem:[%s1168_s4 + $0x68] ss:$16 sps:$4 sm:$0xff]  }
  0x60   : > { %v816_v17 = vld [vmem:[%s1168_s4 + $0x84] ss:$16 sps:$4 sm:$0xff]   ;;  %v818_v18 = vld [vmem:[%s1168_s4 + $0x8c] ss:$16 sps:$4 sm:$0xff]   ;;  %v820_v19 = vld [vmem:[%s1168_s4 + $0x80] ss:$16 sps:$4 sm:$0xff]  }
  0x61   : > { %v821_v20 = vld [vmem:[%s1168_s4 + $0x88] ss:$16 sps:$4 sm:$0xff]   ;;  %v822_v21 = vld [vmem:[%s1168_s4 + $0xa4] ss:$16 sps:$4 sm:$0xff]   ;;  %v824_v22 = vld [vmem:[%s1168_s4 + $0xac] ss:$16 sps:$4 sm:$0xff]  }
  0x62   : > { %396 = vmatpush1.bf16.msra.mxu0 %v802_v7  ;;  %437 = vmatpush1.bf16.msra.mxu1 %v803_v8  ;;  %v826_v23 = vld [vmem:[%s1168_s4 + $0xa0] ss:$16 sps:$4 sm:$0xff]   ;;  %v827_v24 = vld [vmem:[%s1168_s4 + $0xa8] ss:$16 sps:$4 sm:$0xff]   ;;  %v828_v25 = vld [vmem:[%s1168_s4 + $0xc4] ss:$16 sps:$4 sm:$0xff]  }
  0x63   : > { %397 = vmatprep.subr.bf16.mxu0 %v804_v9  ;;  %438 = vmatprep.subr.bf16.mxu1 %v806_v10  ;;  %v830_v26 = vld [vmem:[%s1168_s4 + $0xcc] ss:$16 sps:$4 sm:$0xff]   ;;  %v832_v27 = vld [vmem:[%s1168_s4 + $0xc0] ss:$16 sps:$4 sm:$0xff]   ;;  %v833_v28 = vld [vmem:[%s1168_s4 + $0xc8] ss:$16 sps:$4 sm:$0xff]  }
  0x64   : > { %v834_v29 = vld [vmem:[%s1168_s4 + $0xe4] ss:$16 sps:$4 sm:$0xff]   ;;  %v836_v30 = vld [vmem:[%s1168_s4 + $0xec] ss:$16 sps:$4 sm:$0xff]   ;;  %v838_v31 = vld [vmem:[%s1168_s4 + $0xe0] ss:$16 sps:$4 sm:$0xff]  }
  0x65   : > { %v839_v32 = vld [vmem:[%s1168_s4 + $0xe8] ss:$16 sps:$4 sm:$0xff]   ;;  %v200_v33 = vld [vmem:[#allocation7] sm:$0xf]  ;;  %v993_v34 = vmov 0.0   ;;  %s673_s18 = sshll.u32 %s1164_s19, 5 }
  0x66   : > { %398 = vmatpush1.bf16.msra.mxu0 %v808_v11  ;;  %439 = vmatpush1.bf16.msra.mxu1 %v809_v12  ;;  %198 = vst.msk [vmem:[#allocation2] sm:$0xff] %vm197_vm0, %v993_v34  ;;  %199 = vst.msk [vmem:[#allocation3] sm:$0xff] %vm197_vm0, %v993_v34  ;;  %s712_s20 = sshll.u32 %s978_s12, 9  ;;  %s190_s23 = scalar_lea.vmem [#allocation9], %s673_s18 }
  0x67   : > { %399 = vmatprep.subr.bf16.mxu0 %v810_v13  ;;  %440 = vmatprep.subr.bf16.mxu1 %v812_v14  ;;  %s569_s26 = sshll.u32 %s190_s23, 4  ;;  %s1219_s29 = scalar_lea.hbm %s1270_s2, %s712_s20  ;;  %s1221_s26 = int_to_ptr.vmem [resolvable:$true] %s569_s26 }
  0x68   : > { %s555_s12 = scalar_lea.sflag [#allocation6], %s1164_s19  ;;  %s900_s5 = scalar_lea.vmem %s1221_s26, 512 }
  0x69   : > { %p901_p5 = scmp.ne.s32.totalorder %s1221_s26, %s900_s5  ;;  %p1291_p10 = scmp.ne.s32.totalorder %s1280_s21, 0 }
  0x6a   : > { %400 = vmatpush1.bf16.msra.mxu0 %v814_v15  ;;  %441 = vmatpush1.bf16.msra.mxu1 %v815_v16  ;;  %s994_s17 = smov [#allocation9]  }
  0x6b   : > { %401 = vmatprep.subr.bf16.mxu0 %v816_v17  ;;  %442 = vmatprep.subr.bf16.mxu1 %v818_v18  ;;  %p902_p11 = pnand %p901_p5, %p1291_p10  ;;  %s904_s30 = sshll.u32 %s994_s17, 4  ;;  %s905_s30 = int_to_ptr.vmem [resolvable:$false] %s904_s30 }
  0x6c   : > { %s906_s27 = scalar_lea.vmem %s905_s30, 1024  ;;  %p907_p0 = scmp.lt.s32.totalorder %s1221_s26, %s905_s30 }
  0x6d   : > { %v475_v53 = vld [vmem:[#allocation2] sm:$0xff]  ;;  %v484_v56 = vld [vmem:[#allocation3] sm:$0xff]  ;;  %p903_p1 = pneg %p902_p11  ;;  %p908_p9 = scmp.lt.s32.totalorder %s906_s27, %s900_s5 }
  0x6e   : > { %402 = vmatpush1.bf16.msra.mxu0 %v820_v19  ;;  %443 = vmatpush1.bf16.msra.mxu1 %v821_v20 }
  0x6f   : > { %403 = vmatprep.subr.bf16.mxu0 %v822_v21  ;;  %444 = vmatprep.subr.bf16.mxu1 %v824_v22  ;;  %p909_p3 = por %p908_p9, %p907_p0 }
  0x71   : > { %p910_p7 = pnand %p909_p3, %p903_p1 }
  0x72   : > { %404 = vmatpush1.bf16.msra.mxu0 %v826_v23  ;;  %445 = vmatpush1.bf16.msra.mxu1 %v827_v24 }
  0x73   : > { %405 = vmatprep.subr.bf16.mxu0 %v828_v25  ;;  %446 = vmatprep.subr.bf16.mxu1 %v830_v26 }
  0x76   : > { %406 = vmatpush1.bf16.msra.mxu0 %v832_v27  ;;  %447 = vmatpush1.bf16.msra.mxu1 %v833_v28 }
  0x77   : > { %407 = vmatprep.subr.bf16.mxu0 %v834_v29  ;;  %448 = vmatprep.subr.bf16.mxu1 %v836_v30 }
  0x7a   : > { %408 = vmatpush1.bf16.msra.mxu0 %v838_v31  ;;  %449 = vmatpush1.bf16.msra.mxu1 %v839_v32 }
  0x7d   : > { %426 = vmatmul.mubr.bf16.vlgmr.msra.gmra.mrb[0].mxu0 %v200_v33  ;;  %467 = vmatmul.mubr.bf16.vlgmr.msra.gmra.mrb[0].mxu1 %v200_v33 }
 0x150   : > { %v427_v35 = vpop.f32.mrb[0].mxu0  ;;  %v468_v36 = vpop.f32.mrb[0].mxu1 }
 0x151   : > { %v485_v37 = vmul.f32 %v427_v35, %v427_v35  ;;  %v429_v38 = vpop.f32.mrb[1].mxu0  ;;  %v470_v39 = vpop.f32.mrb[1].mxu1  ;;  %v487_v40 = vmul.f32 %v468_v36, %v468_v36 }
 0x152   : > { %v476_v41 = vadd.f32 %v429_v38, %v427_v35  ;;  %v486_v42 = vmul.f32 %v429_v38, %v429_v38  ;;  %v431_v43 = vpop.f32.mrb[2].mxu0  ;;  %v472_v44 = vpop.f32.mrb[2].mxu1  ;;  %v488_v50 = vmul.f32 %v470_v39, %v470_v39 }
 0x153   : > { %v432_v45 = vpop.f32.mrb[3].mxu0  ;;  %v473_v46 = vpop.f32.mrb[3].mxu1 }
 0x154   : > { %v477_v47 = vadd.f32 %v476_v41, %v468_v36  ;;  %v489_v48 = vadd.f32 %v486_v42, %v485_v37 }
 0x156   : > { %v478_v49 = vadd.f32 %v477_v47, %v470_v39  ;;  %v490_v51 = vadd.f32 %v489_v48, %v487_v40 }
 0x158   : > { %479 = vadd.xlane.f32.xlu0 %v478_v49  ;;  %v491_v52 = vadd.f32 %v490_v51, %v488_v50 }
 0x15c   : > { %492 = vadd.xlane.f32.xlu0 %v491_v52 }
 0x1e5   : > { %v480_v54 = vpop.xlane.xlu0 %479 }
 0x1e6   : > { %v481_v55 = vadd.f32 %v480_v54, %v475_v53 }
 0x1e8   : > { %483 = vst.msk [vmem:[#allocation2] sm:$0xff] %vm197_vm0, %v481_v55 }
 0x1e9   : > { %v493_v57 = vpop.xlane.xlu0 %492 }
 0x1ea   : > { %v494_v58 = vadd.f32 %v493_v57, %v484_v56 }
 0x1ec   : > { %495 = vst.msk [vmem:[#allocation3] sm:$0xff] %vm197_vm0, %v494_v58 }
 0x1ef   : > { %v508_v59 = vld [vmem:[#allocation2] sm:$0xff] }
 0x1f0   : > { %v509_v60 = vmul.f32 0.001953125, %v508_v59 }
 0x1f2   : > { %522 = vperm.xlu1 %790, %v509_v60   ;;  %v512_v63 = vmul.f32 %v509_v60, %v509_v60 }
 0x1f3   : > { %v510_v61 = vld [vmem:[#allocation3] sm:$0xff] }
 0x1f4   : > { %v511_v62 = vmul.f32 0.001953125, %v510_v61 }
 0x1f6   : > { %v513_v0 = vsub.f32 %v511_v62, %v512_v63 }
 0x1f8   : > { %v514_v1 = vadd.f32 1e-05, %v513_v0 }
 0x1fa   : > { %840 = vrsqrt.f32 %v514_v1 }
 0x204   : > { %v841_v2 = vpop.eup %840 }
 0x205   : > { %531 = vperm.xlu1 %790, %v841_v2  }
 0x271   : > { %v523_v3 = vpop.permute.xlu1 %522 }
 0x272   : > { %v525_v4 = vsub.f32 %v427_v35, %v523_v3  ;;  %v526_v5 = vsub.f32 %v429_v38, %v523_v3  ;;  %v527_v6 = vsub.f32 %v468_v36, %v523_v3  ;;  %v528_v7 = vsub.f32 %v470_v39, %v523_v3 }
 0x284   : > { %v532_v8 = vpop.permute.xlu1 %531 }
 0x285   : > { %v534_v9 = vmul.f32 %v532_v8, %v525_v4  ;;  %v535_v10 = vmul.f32 %v532_v8, %v526_v5  ;;  %v536_v11 = vmul.f32 %v532_v8, %v527_v6  ;;  %v537_v12 = vmul.f32 %v532_v8, %v528_v7 }
 0x287   : > { %vm538_vm1 = vcmp.ge.f32.partialorder %v534_v9, 0.0  ;;  %vm539_vm2 = vcmp.ge.f32.partialorder %v535_v10, 0.0  ;;  %vm540_vm3 = vcmp.ge.f32.partialorder %v536_v11, 0.0  ;;  %vm541_vm4 = vcmp.ge.f32.partialorder %v537_v12, 0.0 }
 0x288   : > { %v542_v13 = vmul.f32 0.01, %v534_v9  ;;  %v543_v14 = vmul.f32 0.01, %v535_v10  ;;  %v544_v15 = vmul.f32 0.01, %v536_v11 }
 0x289   : > { %v545_v16 = vmul.f32 0.01, %v537_v12 }
 0x28a   : > { %v546_v17 = vsel %vm538_vm1, %v534_v9, %v542_v13  ;;  %v547_v18 = vsel %vm539_vm2, %v535_v10, %v543_v14  ;;  %v548_v19 = vsel %vm540_vm3, %v536_v11, %v544_v15 }
 0x28b   : > { %v549_v20 = vsel %vm541_vm4, %v537_v12, %v545_v16  ;;  %550 = vst [vmem:[%s190_s23] sm:$0xff] %v546_v17  ;;  %551 = vst [vmem:[%s190_s23 + $0x8] sm:$0xff] %v547_v18 }
 0x28c   : > { %552 = vst [vmem:[%s190_s23 + $0x10] sm:$0xff] %v548_v19  ;;  %553 = vst [vmem:[%s190_s23 + $0x18] sm:$0xff] %v549_v20 }
 0x28d   : > { %913 = shalt.err (!%p910_p7)
}
 0x28e   : > { %s914_s6 = scalar_lea.hbm %s1219_s29, 512  ;;  %s918_s19 = scalar_lea.hbm %s1270_s2, 1024 }
 0x28f   : > { %p915_p13 = scmp.ne.s32.totalorder %s1219_s29, %s914_s6  ;;  %p919_p12 = scmp.lt.u32.totalorder %s1219_s29, %s1270_s2 }
 0x290   : > { %p920_p4 = scmp.lt.u32.totalorder %s918_s19, %s914_s6  ;;  %p922_p5 = scmp.lt.u32.totalorder %s914_s6, %s1219_s29 }
 0x291   : > { %p916_p2 = pnand %p915_p13, %p1291_p10 }
 0x292   : > { %p921_p8 = por %p920_p4, %p919_p12 }
 0x293   : > { %p917_p6 = pneg %p916_p2 }
 0x294   : > { %p923_p11 = por %p922_p5, %p921_p8 }
 0x296   : > { %p924_p1 = pnand %p923_p11, %p917_p6 }
 0x298   : > { %927 = shalt.err (!%p924_p1)
}
 0x299   : > { %719 = dma.vmem_to_hbm [thread:$0]  (%p1291_p10), %s1221_s26, 512, %s1219_s29, %s555_s12  }
 0x29a PF: > { %s581_s4 = sand.u32 1, %s966_s9   ;;  %p1292_p0 = scmp.ne.s32.totalorder %s1281_s22, 0 }
 0x29b   : > { %p1293_p9 = scmp.ge.s32.totalorder %s986_s14, 2  ;;  %s582_s18 = scalar_lea.sflag [#allocation6], %s581_s4 }
 0x29d   : > { %p730_p3 = pnand %p1293_p9, %p1292_p0 }
 0x29f   : > { %961 = dma.done.wait (!%p730_p3), %s582_s18, 512  }
 0x2a0   : > { %963 = vsyncadd (!%p730_p3), %s582_s18, 4294966784  ;;  %s19_s14 = sadd.s32 1, %s986_s14   ;;  %s1294_s9 = smov %s970_s10 }
 0x2a1   : > { %p16_p7 = scmp.ge.s32.totalorder %s19_s14, 4   ;;  %s1295_s10 = smov %s974_s11 }
 0x2a2   : > { %s1296_s11 = smov %s1129_s25  ;;  %s1297_s12 = smov %s982_s13 }
 0x2a3   : > { %s1298_s13 = smov %s1300_s28  ;;  %18 = sbr.rel (!%p16_p7) target bundleno = 7 (0x7), region = 86 }
 0x2aa   :  { %587 = vsyncpa [#allocation5], 1 }
 0x2ab   :  { %589 = vsyncpa [#allocation5 + $0x1], 1 }
 0x2ac   :  { %590 = vsyncpa [#allocation8], 1 }
 0x2ad   :  { %591 = vsyncpa [#allocation6], 1 }
 0x2ae   :  { %593 = vsyncpa [#allocation6 + $0x1], 1 }

</bundles_post_ra>
